<compile_context>
chip_gen: v7x
topology: tpu7x:2x2x1
jax: 0.10.0
libtpu: 0.0.40
codegen_flags: <defaults>
</compile_context>

<pallas_src>
import jax
import jax.numpy as jnp
from jax.experimental import pallas as pl
from jax.experimental.pallas import tpu as pltpu


# ----------------------------------------------------------------------------
# Small helpers
# ----------------------------------------------------------------------------
def _round_up(x, m):
    return ((x + m - 1) // m) * m


def _cdiv(a, b):
    return (a + b - 1) // b


def _vmem_cap_bytes():
    """~80% of physical VMEM (v5e/v6e: ~102 MiB, v7x: ~51 MiB)."""
    cap = 64 * 1024 * 1024
    try:
        info = pltpu.get_tpu_info()
        cap = int(getattr(info, "vmem_capacity_bytes", cap) or cap)
    except Exception:
        pass
    return max(int(cap * 0.8), 32 * 1024 * 1024)


def _tile_dim(dim, req, align, single_tile_max=1024):
    """(padded_dim, tile). Single full tile when small; otherwise near-even
    aligned tiles of ~`req` (pads by at most a few `align`s, never collapses
    the tile to `align`)."""
    padded = _round_up(dim, align)
    req = max(align, _round_up(req, align))
    if padded <= req or padded <= single_tile_max:
        return padded, padded
    m = _cdiv(padded, req)
    tile = _round_up(_cdiv(padded, m), align)
    return m * tile, tile


def _batch_tiling(B, tb_cap):
    """Returns (B_padded, tb). tb is 8-aligned unless it equals the full
    (un-padded) batch, which is exempt from the sublane rule."""
    if B <= tb_cap:
        if B >= 256 and B % 16 == 0:
            return B, B // 2            # two tiles -> both v7x TCs get work
        return B, B                     # one full-dim tile, zero host padding
    B_p16 = _round_up(B, 16)
    if B_p16 <= 2 * tb_cap:
        return B_p16, B_p16 // 2
    tb = tb_cap
    return _round_up(B, tb), tb


# ----------------------------------------------------------------------------
# Kernels
# ----------------------------------------------------------------------------
def _encoder_kernel_fused(x_ref, w_ref, b_ref, o_ref):
    # Single-pass: full K is resident, so no accumulator / pl.when needed.
    acc = jnp.dot(x_ref[...], w_ref[...], preferred_element_type=jnp.float32)
    acc = acc + b_ref[...].astype(jnp.float32)
    o_ref[...] = jnp.maximum(acc, 0.0).astype(o_ref.dtype)


def _encoder_kernel_tiled(x_ref, w_ref, b_ref, o_ref, acc_ref):
    # Grid axes: i = batch tile, j = hidden tile, k = reduction tile.
    k = pl.program_id(2)

    @pl.when(k == 0)
    def _():
        acc_ref[...] = jnp.zeros_like(acc_ref)

    acc_ref[...] += jnp.dot(
        x_ref[...], w_ref[...], preferred_element_type=jnp.float32)

    @pl.when(k == pl.num_programs(2) - 1)
    def _():
        acc = acc_ref[...] + b_ref[...].astype(jnp.float32)
        o_ref[...] = jnp.maximum(acc, 0.0).astype(o_ref.dtype)


# ----------------------------------------------------------------------------
# Paths
# ----------------------------------------------------------------------------
def _fast_path(x2, w, b, out_dtype, cap):
    """Weight-resident single pass: weight/bias DMA'd once, x/y streamed once."""
    B, D_in = x2.shape
    D_h = w.shape[1]
    in_bytes = jnp.dtype(x2.dtype).itemsize
    out_bytes = jnp.dtype(out_dtype).itemsize
    w_bytes = D_in * D_h * in_bytes

    # Batch-tile cap from the VMEM budget left after the (double-buffered)
    # resident weight + bias, with a few MiB of compiler headroom.
    per_row = 2 * (D_in * in_bytes + D_h * out_bytes)   # dbl-buffered x + y row
    stream_budget = max(cap - 2 * w_bytes - 2 * D_h * 4 - (4 << 20), 4 << 20)
    tb_cap = max(8, min(1024, int(stream_budget // per_row) // 8 * 8))

    B_p, tb = _batch_tiling(B, tb_cap)
    if B_p != B:
        # Only reached when B > 2*tb_cap (pad is < tb rows of a large batch)
        # or for the tiny 16-alignment of the two-tile split.
        x2 = jnp.pad(x2, ((0, B_p - B), (0, 0)))

    b2 = b.astype(jnp.float32).reshape(1, D_h)

    needed = 2 * w_bytes + 2 * D_h * 4 + per_row * tb
    vmem_limit = int(min(cap, max(int(1.5 * needed), 16 << 20)))

    cost = pl.CostEstimate(
        flops=2 * B_p * D_in * D_h,
        transcendentals=0,
        bytes_accessed=(B_p * D_in * in_bytes + w_bytes + D_h * 4
                        + B_p * D_h * out_bytes),
    )

    out = pl.pallas_call(
        _encoder_kernel_fused,
        out_shape=jax.ShapeDtypeStruct((B_p, D_h), out_dtype),
        grid_spec=pltpu.PrefetchScalarGridSpec(
            num_scalar_prefetch=0,
            grid=(B_p // tb,),
            in_specs=[
                pl.BlockSpec((tb, D_in), lambda i: (i, 0)),      # x stream
                pl.BlockSpec((D_in, D_h), lambda i: (0, 0)),     # resident W
                pl.BlockSpec((1, D_h), lambda i: (0, 0)),        # resident b
            ],
            out_specs=pl.BlockSpec((tb, D_h), lambda i: (i, 0)),
        ),
        compiler_params=pltpu.CompilerParams(
            dimension_semantics=("parallel",),
            vmem_limit_bytes=vmem_limit,
        ),
        cost_estimate=cost,
    )(x2, w, b2)

    if B_p != B:
        out = out[:B]
    return out


def _tiled_path(x2, w, b, out_dtype, cap, tb_req, tn_req, tk_req):
    """Fallback for weights too large to keep resident in VMEM."""
    B, D_in = x2.shape
    D_h = w.shape[1]
    in_bytes = jnp.dtype(x2.dtype).itemsize
    out_bytes = jnp.dtype(out_dtype).itemsize

    B_p, tb = _tile_dim(B, tb_req, 8)
    D_h_p, tn = _tile_dim(D_h, tn_req, 128)
    D_in_p, tk = _tile_dim(D_in, tk_req, 128)

    # Zero-padding along K is REQUIRED for correctness of the reduction;
    # padded hidden columns / batch rows are sliced away below.
    x_p = jnp.pad(x2, ((0, B_p - B), (0, D_in_p - D_in)))
    w_p = jnp.pad(w, ((0, D_in_p - D_in), (0, D_h_p - D_h)))
    b_p = jnp.pad(b.astype(jnp.float32), (0, D_h_p - D_h)).reshape(1, D_h_p)

    gm, gn, gk = B_p // tb, D_h_p // tn, D_in_p // tk

    # Honest traffic estimate: x is re-read gn times, w is re-read gm times.
    cost = pl.CostEstimate(
        flops=2 * B_p * D_in_p * D_h_p,
        transcendentals=0,
        bytes_accessed=(x_p.size * in_bytes * gn + w_p.size * in_bytes * gm
                        + b_p.size * 4 * gm + B_p * D_h_p * out_bytes),
    )

    tile_bytes = (2 * (tb * tk * in_bytes + tk * tn * in_bytes + tn * 4
                       + tb * tn * out_bytes)
                  + (tb * tn * 4 if gk > 1 else 0))
    vmem_limit = int(min(cap, max(2 * tile_bytes, 16 << 20)))

    if gk == 1:
        # Reduction fits one tile: fused kernel, no accumulator scratch.
        out = pl.pallas_call(
            _encoder_kernel_fused,
            out_shape=jax.ShapeDtypeStruct((B_p, D_h_p), out_dtype),
            grid_spec=pltpu.PrefetchScalarGridSpec(
                num_scalar_prefetch=0,
                grid=(gm, gn),
                in_specs=[
                    pl.BlockSpec((tb, tk), lambda i, j: (i, 0)),
                    pl.BlockSpec((tk, tn), lambda i, j: (0, j)),
                    pl.BlockSpec((1, tn), lambda i, j: (0, j)),
                ],
                out_specs=pl.BlockSpec((tb, tn), lambda i, j: (i, j)),
            ),
            compiler_params=pltpu.CompilerParams(
                dimension_semantics=("parallel", "parallel"),
                vmem_limit_bytes=vmem_limit,
            ),
            cost_estimate=cost,
        )(x_p, w_p, b_p)
    else:
        out = pl.pallas_call(
            _encoder_kernel_tiled,
            out_shape=jax.ShapeDtypeStruct((B_p, D_h_p), out_dtype),
            grid_spec=pltpu.PrefetchScalarGridSpec(
                num_scalar_prefetch=0,
                grid=(gm, gn, gk),
                in_specs=[
                    pl.BlockSpec((tb, tk), lambda i, j, k: (i, k)),
                    pl.BlockSpec((tk, tn), lambda i, j, k: (k, j)),
                    pl.BlockSpec((1, tn), lambda i, j, k: (0, j)),
                ],
                out_specs=pl.BlockSpec((tb, tn), lambda i, j, k: (i, j)),
                scratch_shapes=[pltpu.VMEM((tb, tn), jnp.float32)],
            ),
            compiler_params=pltpu.CompilerParams(
                dimension_semantics=("parallel", "parallel", "arbitrary"),
                vmem_limit_bytes=vmem_limit,
            ),
            cost_estimate=cost,
        )(x_p, w_p, b_p)

    if (B_p, D_h_p) != (B, D_h):
        out = out[:B, :D_h]
    return out


# ----------------------------------------------------------------------------
# Public wrapper
# ----------------------------------------------------------------------------
def shallow_encoder(x, w, b, *, operand_dtype=None, out_dtype=None,
                    tb=512, tn=512, tk=512,
                    weight_resident_bytes=16 * 1024 * 1024):
    """y = relu(x @ w + b).

    x: [..., D_in], w: [D_in, D_h] (PyTorch linear.weight transposed),
    b: [D_h]. `operand_dtype=jnp.bfloat16` feeds bf16 operands to the MXU
    (f32 accumulation kept; recommended on v6e/v7x when the consumer allows);
    output dtype defaults to x's dtype.
    """
    orig_shape = x.shape
    D_in = orig_shape[-1]
    D_h = w.shape[1]
    if out_dtype is None:
        out_dtype = x.dtype

    x2 = x.reshape(-1, D_in)
    if operand_dtype is not None:
        x2 = x2.astype(operand_dtype)
        w = w.astype(operand_dtype)

    cap = _vmem_cap_bytes()
    in_bytes = jnp.dtype(x2.dtype).itemsize
    w_bytes = D_in * D_h * in_bytes

    # Weight-resident fast path covers essentially every ShallowEncoder.
    threshold = min(weight_resident_bytes, cap // 6)
    if w_bytes <= threshold:
        out = _fast_path(x2, w, b, out_dtype, cap)
    else:
        out = _tiled_path(x2, w, b, out_dtype, cap, tb, tn, tk)

    return out.reshape(*orig_shape[:-1], D_h)


# ----------------------------------------------------------------------------
# Tests
# ----------------------------------------------------------------------------
if __name__ == "__main__":
    key = jax.random.PRNGKey(0)

    # --- Test 1: module-sized shapes (batch=8, input_dim=16, hidden_dim=32).
    B, D_in, D_h = 8, 16, 32
    kx, kw, kb = jax.random.split(key, 3)
    x = jax.random.normal(kx, (B, D_in), dtype=jnp.float32)
    bound = float(D_in) ** -0.5
    w = jax.random.uniform(kw, (D_in, D_h), minval=-bound, maxval=bound,
                           dtype=jnp.float32)
    b = jax.random.uniform(kb, (D_h,), minval=-bound, maxval=bound,
                           dtype=jnp.float32)

    y = jax.block_until_ready(shallow_encoder(x, w, b))
    y_ref = jnp.maximum(x @ w + b, 0.0)
    assert y.shape == (B, D_h)
    assert jnp.allclose(y, y_ref, atol=1e-5, rtol=1e-5)

    # --- Test 1b: leading batch dims are flattened/restored.
    y3d = jax.block_until_ready(shallow_encoder(x.reshape(2, 4, D_in), w, b))
    assert y3d.shape == (2, 4, D_h)
    assert jnp.allclose(y3d.reshape(B, D_h), y_ref, atol=1e-5, rtol=1e-5)

    # --- Test 2: ragged, non-128-aligned shapes on the weight-resident fast
    # path (also exercises the two-way batch split for megacore).
    B2, D_in2, D_h2 = 272, 96, 136
    k2x, k2w, k2b = jax.random.split(jax.random.PRNGKey(1), 3)
    x2 = jax.random.normal(k2x, (B2, D_in2), dtype=jnp.float32)
    bound2 = float(D_in2) ** -0.5
    w2 = jax.random.uniform(k2w, (D_in2, D_h2), minval=-bound2, maxval=bound2,
                            dtype=jnp.float32)
    b2 = jax.random.uniform(k2b, (D_h2,), minval=-bound2, maxval=bound2,
                            dtype=jnp.float32)
    y2 = jax.block_until_ready(shallow_encoder(x2, w2, b2))
    y2_ref = jnp.maximum(jnp.dot(x2, w2, precision="highest") + b2, 0.0)
    assert y2.shape == (B2, D_h2)
    assert jnp.allclose(y2, y2_ref, atol=1e-2, rtol=1e-2)

    # --- Test 3: force the tiled fallback (K accumulation across grid steps).
    B3, D_in3, D_h3 = 272, 1100, 136
    k3x, k3w, k3b = jax.random.split(jax.random.PRNGKey(2), 3)
    x3 = jax.random.normal(k3x, (B3, D_in3), dtype=jnp.float32)
    bound3 = float(D_in3) ** -0.5
    w3 = jax.random.uniform(k3w, (D_in3, D_h3), minval=-bound3, maxval=bound3,
                            dtype=jnp.float32)
    b3 = jax.random.uniform(k3b, (D_h3,), minval=-bound3, maxval=bound3,
                            dtype=jnp.float32)
    y3 = jax.block_until_ready(
        shallow_encoder(x3, w3, b3, weight_resident_bytes=0))
    y3_ref = jnp.maximum(jnp.dot(x3, w3, precision="highest") + b3, 0.0)
    assert y3.shape == (B3, D_h3)
    assert jnp.allclose(y3, y3_ref, atol=2e-2, rtol=2e-2)

    # --- Test 4: bf16 operands for the MXU (f32 accumulation, f32 output).
    y4 = jax.block_until_ready(
        shallow_encoder(x2, w2, b2, operand_dtype=jnp.bfloat16))
    assert y4.dtype == jnp.float32
    assert jnp.allclose(y4, y2_ref, atol=1e-1, rtol=1e-1)

    print("KERNEL_OK")
</pallas_src>

<mosaic_0001>
module attributes {stable_mosaic.version = 11 : i64} {
  func.func @_encoder_kernel_fused(%arg0: i32, %arg1: memref<8x16xf32, #tpu.memory_space<vmem>>, %arg2: memref<16x32xf32, #tpu.memory_space<vmem>>, %arg3: memref<1x32xf32, #tpu.memory_space<vmem>>, %arg4: memref<8x32xf32, #tpu.memory_space<vmem>>) attributes {dimension_semantics = [#tpu.dimension_semantics<parallel>], iteration_bounds = array<i64: 1>, scalar_prefetch = 0 : i64, scratch_operands = 0 : i64, tpu.core_type = #tpu.core_type<tc>, window_params = [{transform_indices = @transform_0, window_bounds = array<i64: 8, 16>}, {pipeline_mode = #tpu.pipeline_mode<synchronous>, transform_indices = @transform_1, window_bounds = array<i64: 16, 32>}, {pipeline_mode = #tpu.pipeline_mode<synchronous>, transform_indices = @transform_2, window_bounds = array<i64: 1, 32>}, {transform_indices = @transform_3, window_bounds = array<i64: 8, 32>}]} {
    %c0 = arith.constant 0 : index
    %c0_0 = arith.constant 0 : index
    %0 = vector.load %arg1[%c0, %c0_0] : memref<8x16xf32, #tpu.memory_space<vmem>>, vector<8x16xf32>
    %c0_1 = arith.constant 0 : index
    %c0_2 = arith.constant 0 : index
    %1 = vector.load %arg2[%c0_1, %c0_2] : memref<16x32xf32, #tpu.memory_space<vmem>>, vector<16x32xf32>
    %cst = arith.constant dense<0.000000e+00> : vector<8x32xf32>
    %2 = tpu.matmul %0, %1, %cst {dimension_numbers = #tpu.dot_dimension_numbers<[1], [0], [0], [1], [0, 0, 1, 1], [], []>} : vector<8x16xf32>, vector<16x32xf32>, vector<8x32xf32> -> vector<8x32xf32>
    %c0_3 = arith.constant 0 : index
    %c0_4 = arith.constant 0 : index
    %3 = vector.load %arg3[%c0_3, %c0_4] : memref<1x32xf32, #tpu.memory_space<vmem>>, vector<1x32xf32>
    %4 = vector.broadcast %3 : vector<1x32xf32> to vector<8x32xf32>
    %5 = arith.addf %2, %4 : vector<8x32xf32>
    %cst_5 = arith.constant 0.000000e+00 : f32
    %6 = vector.broadcast %cst_5 : f32 to vector<8x32xf32>
    %7 = arith.maximumf %5, %6 : vector<8x32xf32>
    %c0_6 = arith.constant 0 : index
    %c0_7 = arith.constant 0 : index
    %8 = vector.load %arg4[%c0_6, %c0_7] : memref<8x32xf32, #tpu.memory_space<vmem>>, vector<8x32xf32>
    tpu.vector_store %arg4[%c0_6, %c0_7], %7 {strides = array<i32>} : memref<8x32xf32, #tpu.memory_space<vmem>>, vector<8x32xf32>,
    return
  }
  func.func @transform_0(%arg0: i32) -> (i32, i32) {
    %c0_i32 = arith.constant 0 : i32
    %c0_i32_0 = arith.constant 0 : i32
    return %arg0, %c0_i32 : i32, i32
  }
  func.func @transform_1(%arg0: i32) -> (i32, i32) {
    %c0_i32 = arith.constant 0 : i32
    %c0_i32_0 = arith.constant 0 : i32
    %c0_i32_1 = arith.constant 0 : i32
    return %c0_i32, %c0_i32_0 : i32, i32
  }
  func.func @transform_2(%arg0: i32) -> (i32, i32) {
    %c0_i32 = arith.constant 0 : i32
    %c0_i32_0 = arith.constant 0 : i32
    %c0_i32_1 = arith.constant 0 : i32
    return %c0_i32, %c0_i32_0 : i32, i32
  }
  func.func @transform_3(%arg0: i32) -> (i32, i32) {
    %c0_i32 = arith.constant 0 : i32
    %c0_i32_0 = arith.constant 0 : i32
    return %arg0, %c0_i32 : i32, i32
  }
}

</mosaic_0001>

<bundles_post_ra>
// kernel: tpu_custom_call.1
= control target key start
LH: loop header
LB: loop body
LE: loop exit
PB: predicated region body
PF: predicated region fallthrough
CT: control target
= control target key end

     0   :  { %8 = vsyncpa [#allocation3], 0  ;;  %s313_s0 = inlined_call_operand.hbm [shape: f32[8,16], index: 0, kind: input, shape index: {}]   ;;  %s314_s1 = inlined_call_operand.hbm [shape: f32[16,32], index: 1, kind: input, shape index: {}]   ;;  %s315_s2 = inlined_call_operand.vmem [shape: f32[1,32], index: 2, kind: input, shape index: {}]   ;;  %s316_s3 = inlined_call_operand.hbm [shape: f32[8,32], index: 3, kind: output, shape index: {}]  }
   0x1   :  { %9 = vsyncpa [#allocation6], 0 }
   0x2   :  { %10 = vsyncpa [#allocation4], 0  ;;  %s239_s12 = smov [#allocation2]   ;;  %s240_s14 = smov [#allocation5]  }
   0x3   :  { %s17_s13 = sshll.u32 %s239_s12, 4  ;;  %s26_s15 = sshll.u32 %s240_s14, 4  ;;  %s18_s13 = int_to_ptr.vmem [resolvable:$true] %s17_s13  ;;  %s267_s15 = int_to_ptr.vmem [resolvable:$true] %s26_s15 }
   0x4   :  { %s167_s18 = scalar_lea.hbm %s313_s0, 128 }
   0x5   :  { %p168_p0 = scmp.ne.s32.totalorder %s313_s0, %s167_s18  ;;  %p171_p1 = scmp.lt.u32.totalorder %s167_s18, %s313_s0 }
   0x7   :  { %p173_p2 = pnand %p171_p1, %p168_p0 }
   0x9   :  { %176 = shalt.err (!%p173_p2)
}
   0xa   :  { %s177_s23 = scalar_lea.vmem %s18_s13, 128  ;;  %p182_p4 = scmp.lt.s32.totalorder %s18_s13, %s18_s13 }
   0xb   :  { %p178_p3 = scmp.ne.s32.totalorder %s18_s13, %s177_s23  ;;  %p183_p5 = scmp.lt.s32.totalorder %s177_s23, %s177_s23 }
   0xd   :  { %p184_p6 = por %p183_p5, %p182_p4 }
   0xf   :  { %p185_p7 = pnand %p184_p6, %p178_p3 }
  0x11   :  { %188 = shalt.err (!%p185_p7)
}
  0x12   :  { %20 = dma.hbm_to_vmem [thread:$0]  %s313_s0, 128, %s18_s13, [#allocation3]  }
  0x13   :  { %s189_s28 = scalar_lea.hbm %s314_s1, 256 }
  0x14   :  { %p190_p8 = scmp.ne.s32.totalorder %s314_s1, %s189_s28  ;;  %p193_p9 = scmp.lt.u32.totalorder %s189_s28, %s314_s1 }
  0x16   :  { %p195_p10 = pnand %p193_p9, %p190_p8 }
  0x18   :  { %198 = shalt.err (!%p195_p10)
}
  0x19   :  { %s199_s6 = scalar_lea.vmem %s267_s15, 256  ;;  %p204_p12 = scmp.lt.s32.totalorder %s267_s15, %s267_s15 }
  0x1a   :  { %p200_p11 = scmp.ne.s32.totalorder %s267_s15, %s199_s6  ;;  %p205_p13 = scmp.lt.s32.totalorder %s199_s6, %s199_s6 }
  0x1c   :  { %p206_p0 = por %p205_p13, %p204_p12 }
  0x1e   :  { %p207_p1 = pnand %p206_p0, %p200_p11 }
  0x20   :  { %210 = shalt.err (!%p207_p1)
}
  0x21   :  { %s241_s0 = smov 128   ;;  %s242_s7 = smov 8  }
  0x22   :  { %32 = dma.hbm_to_vmem [thread:$0]  %s314_s1, 256, %s267_s15, [#allocation6], %s241_s0, %s241_s0, %s242_s7  }
  0x23   :  { %233 = dma.done.wait [#allocation3], 128  }
  0x24   :  { %234 = vsyncadd [#allocation3], 4294967168 }
  0x25   :  { %235 = dma.done.wait [#allocation6], 256  }
  0x26   :  { %236 = vsyncadd [#allocation6], 4294967040  ;;  %v243_v0 = vmov 0.0|0.0   ;;  %vm244_vm0 = vmmov 0   ;;  %v245_v1 = vmov 0.0   ;;  %v42_v2 = vld [vmem:[#allocation5] sm:$0xff] }
  0x27   :  { %156 = vmatprep.subr.bf16.mxu0 %v243_v0  ;;  %153 = vmatprep.mubr.msk.f32.mxu0 %vm244_vm0, %v245_v1  ;;  %v43_v3 = vld [vmem:[#allocation5 + $0x8] sm:$0xff]  ;;  %v41_v5 = vld [vmem:[#allocation2] sm:$0xff]  ;;  %vm51_vm1 = vcmask 130048   ;;  %s246_s1 = smov [#allocation7]   ;;  %vm126_vm2 = vcmask 261120  }
  0x28   :  { %v157_v4 = vpack.c.bf16 %v43_v3, %v42_v2  ;;  %v144_v6 = vld [vmem:[%s315_s2] ss:$0 sm:$0xff]  ;;  %s134_s12 = sshll.u32 %s246_s1, 4  ;;  %s135_s12 = int_to_ptr.vmem [resolvable:$true] %s134_s12 }
  0x29   :  { %s211_s13 = scalar_lea.vmem %s135_s12, 128  ;;  %p216_p3 = scmp.lt.s32.totalorder %s135_s12, %s135_s12 }
  0x2a   :  { %158 = vmatpush3.bf16.msra.mxu0 %v157_v4  ;;  %p212_p2 = scmp.ne.s32.totalorder %s135_s12, %s211_s13  ;;  %p217_p4 = scmp.lt.s32.totalorder %s211_s13, %s211_s13 }
  0x2c   :  { %p218_p5 = por %p217_p4, %p216_p3 }
  0x2d   :  { %154 = vmatmul.mubr.msk.f32.vlgmr.msra.gmra.mrb[0].mxu0 %vm51_vm1, %v41_v5 }
  0x2e   :  { %p219_p6 = pnand %p218_p5, %p212_p2 }
 0x100   :  { %v121_v7 = vpop.f32.mrb[0].mxu0 }
 0x101   :  { %v122_v8 = vadd.f32 %v144_v6, %v121_v7  ;;  %v155_v9 = vpop.f32.mrb[1].mxu0 }
 0x103   :  { %v125_v10 = vmax.f32 %v122_v8, 0.0 }
 0x105   :  { %127 = vst.msk [vmem:[#allocation7] sm:$0xff] %vm126_vm2, %v125_v10 }
 0x106   :  { %222 = shalt.err (!%p219_p6)
}
 0x107   :  { %s223_s2 = scalar_lea.hbm %s316_s3, 128 }
 0x108   :  { %p224_p7 = scmp.ne.s32.totalorder %s316_s3, %s223_s2  ;;  %p227_p8 = scmp.lt.u32.totalorder %s223_s2, %s316_s3 }
 0x10a   :  { %p229_p9 = pnand %p227_p8, %p224_p7 }
 0x10c   :  { %232 = shalt.err (!%p229_p9)
}
 0x10d   :  { %137 = dma.vmem_to_hbm [thread:$0]  %s135_s12, 128, %s316_s3, [#allocation4]  }
 0x10e   :  { %237 = dma.done.wait [#allocation4], 128  }
 0x10f   :  { %238 = vsyncadd [#allocation4], 4294967168 }
 0x110   :  { %141 = vsyncpa [#allocation3], 1 }
 0x111   :  { %142 = vsyncpa [#allocation6], 1 }
 0x112   :  { %143 = vsyncpa [#allocation4], 1 }

</bundles_post_ra>
